<compile_context>
chip_gen: v7x
topology: tpu7x:2x2x1
jax: 0.10.0
libtpu: 0.0.40
codegen_flags: <defaults>
</compile_context>

<pallas_src>
import functools

import jax
import jax.numpy as jnp
from jax import lax
from jax.experimental import pallas as pl
from jax.experimental.pallas import tpu as pltpu

_EPS = 1e-8  # PyTorch cosine_similarity default eps (clamps ||x1||*||x2||)


def _triplet_loss_kernel(scal_ref, anchor_ref, pos_ref, neg_ref, out_ref,
                         acc_ref, *, batch, tiles_per_core, need_mask):
    c = pl.program_id(0)   # partial-sum / core index ("parallel")
    i = pl.program_id(1)   # batch-tile index within this core ("arbitrary")

    @pl.when(i == 0)
    def _init():
        acc_ref[...] = jnp.zeros_like(acc_ref)

    margin = scal_ref[0]      # SMEM scalars: no recompile per hyper-parameter
    inv_div = scal_ref[1]

    eps_sq = jnp.float32(_EPS * _EPS)

    a = anchor_ref[...].astype(jnp.float32)              # (tb, D)
    sq_a = jnp.sum(a * a, axis=-1, keepdims=True)        # (tb, 1)

    # One branch at a time -> only a single (tb, K, D) f32 temporary live.
    def branch_cos(x_ref):
        x = x_ref[...].astype(jnp.float32)                # (tb, K, D)
        sq_x = jnp.sum(x * x, axis=-1)                    # (tb, K)
        dot = jnp.sum(a[:, None, :] * x, axis=-1)         # (tb, K)
        # PyTorch: dot / sqrt(max(||a||^2 * ||x||^2, eps^2)); rsqrt -> EUP.
        return dot * lax.rsqrt(jnp.maximum(sq_a * sq_x, eps_sq))

    cos_p = branch_cos(pos_ref)               # phase 1: positives
    cos_n = jnp.abs(branch_cos(neg_ref))      # phase 2: negatives

    losses = jnp.maximum(cos_n + margin - cos_p, 0.0)     # (tb, K)

    if need_mask:
        tb = losses.shape[0]
        g = c * tiles_per_core + i            # UN-clamped global tile index
        row = lax.broadcasted_iota(jnp.int32, losses.shape, 0) + g * tb
        losses = jnp.where(row < batch, losses, 0.0)

    # Steady state: pure VPU add into the vector accumulator (no XLU reduce).
    acc_ref[...] += losses

    @pl.when(i == pl.num_programs(1) - 1)
    def _finalize():
        total = jnp.sum(acc_ref[...], axis=(0, 1), keepdims=True) * inv_div
        out_ref[...] = jnp.broadcast_to(total.reshape(1, 1, 1), out_ref.shape)


def triplet_loss(anchor, pos, neg, margin, size_average=False, *, tb=None):
    """anchor: (B, D); pos, neg: (B, K, D). Returns a scalar f32."""
    B, D = anchor.shape
    Bp, K, Dp = pos.shape
    assert (Bp, Dp) == (B, D) and neg.shape == pos.shape

    in_item = pos.dtype.itemsize
    a_item = anchor.dtype.itemsize
    # Sub-32-bit dtypes pack rows along sublanes: 8 (f32) / 16 (bf16) / 32 (i8).
    pack = 8 * max(1, 4 // a_item)

    # Bytes per batch row: double-buffered input DMA blocks + live f32
    # temporaries (one upcast (K,D) branch + its product, anchor, partials).
    dma_row = 2 * K * D * in_item + D * a_item
    f32_row = (2 * K * D + D + 2 * K) * 4
    row_bytes = 2 * dma_row + f32_row

    if tb is None:
        # ~10 MiB per-step working set amortizes the ~600-cycle grid-step
        # overhead (tb ~ 400 for K=8, D=128 f32).
        tb = max(1, (10 << 20) // row_bytes)
    tb = int(min(tb, B))
    if tb < B:
        tb = max(pack, (tb // pack) * pack)
        tb = min(tb, B)

    total_tiles = pl.cdiv(B, tb)
    # Leading "parallel" axis: v7x's 2 TensorCores split the batch tiles;
    # on single-core v5e/v6e it is just a cheap 2-iteration outer loop.
    ncores = 2 if total_tiles >= 2 else 1
    tiles_per_core = pl.cdiv(total_tiles, ncores)
    # Only emit the row mask when a tile can be ragged or phantom.
    need_mask = (B % tb != 0) or (ncores * tiles_per_core != total_tiles)

    inv_divisor = 1.0 / (B * K) if size_average else 1.0 / B
    scalars = jnp.array([margin, inv_divisor], dtype=jnp.float32)

    last_tile = total_tiles - 1

    def tile_index(c, i):
        g = c * tiles_per_core + i
        if ncores * tiles_per_core != total_tiles:
            g = jnp.minimum(g, last_tile)   # clamp phantom tiles (masked to 0)
        return g

    kernel = functools.partial(
        _triplet_loss_kernel,
        batch=B, tiles_per_core=tiles_per_core, need_mask=need_mask)

    # Double-buffered DMA tiles + f32 working set + headroom; 44 MiB cap keeps
    # slack on v7x's 64 MiB physical VMEM per core.
    vmem_limit = int(min(max(tb * row_bytes + (4 << 20), 16 << 20), 44 << 20))

    out = pl.pallas_call(
        kernel,
        out_shape=jax.ShapeDtypeStruct((ncores, 8, 128), jnp.float32),
        grid=(ncores, tiles_per_core),
        in_specs=[
            pl.BlockSpec(memory_space=pltpu.MemorySpace.SMEM),          # scalars
            pl.BlockSpec((tb, D), lambda c, i: (tile_index(c, i), 0)),
            pl.BlockSpec((tb, K, D), lambda c, i: (tile_index(c, i), 0, 0)),
            pl.BlockSpec((tb, K, D), lambda c, i: (tile_index(c, i), 0, 0)),
        ],
        out_specs=pl.BlockSpec((1, 8, 128), lambda c, i: (c, 0, 0)),
        scratch_shapes=[pltpu.VMEM((tb, K), jnp.float32)],
        compiler_params=pltpu.CompilerParams(
            dimension_semantics=("parallel", "arbitrary"),
            vmem_limit_bytes=vmem_limit,
        ),
    )(scalars, anchor, pos, neg)
    # Each core wrote one (already inv_divisor-scaled) partial, broadcast over
    # its lane-dense (8, 128) block; combine the per-core partials.
    return jnp.sum(out[:, 0, 0])


def _reference(anchor, pos, neg, margin, size_average=False):
    """Plain-JAX reference matching torch.nn.functional.cosine_similarity."""
    a = anchor.astype(jnp.float32)[:, None, :]
    p = pos.astype(jnp.float32)
    n = neg.astype(jnp.float32)

    def cos(x1, x2):
        w12 = jnp.sum(x1 * x2, axis=-1)
        w1 = jnp.sum(x1 * x1, axis=-1)
        w2 = jnp.sum(x2 * x2, axis=-1)
        return w12 / jnp.sqrt(jnp.maximum(w1 * w2, _EPS * _EPS))

    dp = cos(a, p)
    dn = jnp.abs(cos(a, n))
    losses = jax.nn.relu(-(dp - dn - margin))
    return losses.mean() if size_average else losses.mean(0).sum()


if __name__ == "__main__":
    margin = 0.2
    key = jax.random.PRNGKey(0)
    K, D = 8, 128

    def make(key, B, dtype=jnp.float32):
        ka, kp, kn, key = jax.random.split(key, 4)
        a = jax.random.normal(ka, (B, D), dtype=jnp.float32).astype(dtype)
        p = jax.random.normal(kp, (B, K, D), dtype=jnp.float32).astype(dtype)
        n = jax.random.normal(kn, (B, K, D), dtype=jnp.float32).astype(dtype)
        return key, a, p, n

    def check(a, p, n, size_average=False, tb=None, tol=1e-5):
        got = triplet_loss(a, p, n, margin, size_average=size_average, tb=tb)
        jax.block_until_ready(got)
        want = _reference(a, p, n, margin, size_average=size_average)
        assert jnp.allclose(got, want, atol=tol, rtol=tol), (got, want)

    # 1) Auto tile size -> single tile, single partial.
    key, a, p, n = make(key, 16)
    check(a, p, n, size_average=False)
    check(a, p, n, size_average=True)

    # 2) Forced small tile -> 2 tiles split across the 2-wide parallel axis.
    #    (tb=8 only exercises the multi-tile path at demo shapes; real
    #     workloads use the multi-hundred-row auto tile.)
    check(a, p, n, size_average=False, tb=8)
    check(a, p, n, size_average=True, tb=8)

    # 3) Ragged batch -> masked last tile.
    key, a, p, n = make(key, 12)
    check(a, p, n, size_average=False, tb=8)

    # 4) Odd tile count -> one core gets a clamped phantom tile (fully masked).
    key, a, p, n = make(key, 20)
    check(a, p, n, size_average=False, tb=8)
    check(a, p, n, size_average=True, tb=8)

    # 5) bf16 inputs -> dtype-aware sublane rounding + in-kernel f32 upcast.
    key, a, p, n = make(key, 32, dtype=jnp.bfloat16)
    check(a, p, n, size_average=False, tb=16)

    print("KERNEL_OK")
</pallas_src>

<mosaic_0001>
module attributes {stable_mosaic.version = 11 : i64} {
  func.func @_triplet_loss_kernel(%arg0: i32, %arg1: i32, %arg2: memref<2xf32, #tpu.memory_space<smem>>, %arg3: memref<16x128xf32, #tpu.memory_space<vmem>>, %arg4: memref<16x8x128xf32, #tpu.memory_space<vmem>>, %arg5: memref<16x8x128xf32, #tpu.memory_space<vmem>>, %arg6: memref<1x8x128xf32, #tpu.memory_space<vmem>>, %arg7: memref<16x8xf32, #tpu.memory_space<vmem>>) attributes {dimension_semantics = [#tpu.dimension_semantics<parallel>, #tpu.dimension_semantics<arbitrary>], iteration_bounds = array<i64: 1, 1>, scalar_prefetch = 0 : i64, scratch_operands = 1 : i64, tpu.core_type = #tpu.core_type<tc>, window_params = [{transform_indices = @transform_0, window_bounds = array<i64: 2>}, {transform_indices = @transform_1, window_bounds = array<i64: 16, 128>}, {transform_indices = @transform_2, window_bounds = array<i64: 16, 8, 128>}, {transform_indices = @transform_3, window_bounds = array<i64: 16, 8, 128>}, {transform_indices = @transform_4, window_bounds = array<i64: 1, 8, 128>}]} {
    %c0_i32 = arith.constant 0 : i32
    %0 = arith.cmpi eq, %arg1, %c0_i32 : i32
    %1 = arith.extui %0 : i1 to i32
    %c0_i32_0 = arith.constant 0 : i32
    %2 = arith.cmpi ne, %1, %c0_i32_0 : i32
    scf.if %2 {
      %cst_22 = arith.constant 0.000000e+00 : f32
      %47 = vector.broadcast %cst_22 : f32 to vector<16x8xf32>
      %c0_23 = arith.constant 0 : index
      %c0_24 = arith.constant 0 : index
      %48 = vector.load %arg7[%c0_23, %c0_24] : memref<16x8xf32, #tpu.memory_space<vmem>>, vector<16x8xf32>
      tpu.vector_store %arg7[%c0_23, %c0_24], %47 {strides = array<i32>} : memref<16x8xf32, #tpu.memory_space<vmem>>, vector<16x8xf32>,
    } else {
    }
    %c0 = arith.constant 0 : index
    %3 = memref.load %arg2[%c0] : memref<2xf32, #tpu.memory_space<smem>>
    %c1 = arith.constant 1 : index
    %4 = memref.load %arg2[%c1] : memref<2xf32, #tpu.memory_space<smem>>
    %c0_1 = arith.constant 0 : index
    %c0_2 = arith.constant 0 : index
    %5 = vector.load %arg3[%c0_1, %c0_2] : memref<16x128xf32, #tpu.memory_space<vmem>>, vector<16x128xf32>
    %6 = arith.mulf %5, %5 : vector<16x128xf32>
    %cst = arith.constant dense<0.000000e+00> : vector<16xf32>
    %7 = vector.multi_reduction <add>, %6, %cst [1] : vector<16x128xf32> to vector<16xf32>
    %8 = vector.shape_cast %7 : vector<16xf32> to vector<16x1xf32>
    %c0_3 = arith.constant 0 : index
    %c0_4 = arith.constant 0 : index
    %c0_5 = arith.constant 0 : index
    %9 = vector.load %arg4[%c0_3, %c0_4, %c0_5] : memref<16x8x128xf32, #tpu.memory_space<vmem>>, vector<16x8x128xf32>
    %10 = arith.mulf %9, %9 : vector<16x8x128xf32>
    %cst_6 = arith.constant dense<0.000000e+00> : vector<16x8xf32>
    %11 = vector.multi_reduction <add>, %10, %cst_6 [2] : vector<16x8x128xf32> to vector<16x8xf32>
    %12 = vector.shape_cast %5 : vector<16x128xf32> to vector<16x1x128xf32>
    %13 = vector.broadcast %12 : vector<16x1x128xf32> to vector<16x8x128xf32>
    %14 = arith.mulf %13, %9 : vector<16x8x128xf32>
    %cst_7 = arith.constant dense<0.000000e+00> : vector<16x8xf32>
    %15 = vector.multi_reduction <add>, %14, %cst_7 [2] : vector<16x8x128xf32> to vector<16x8xf32>
    %16 = vector.broadcast %8 : vector<16x1xf32> to vector<16x8xf32>
    %17 = arith.mulf %16, %11 : vector<16x8xf32>
    %cst_8 = arith.constant 1.000000e-16 : f32
    %18 = vector.broadcast %cst_8 : f32 to vector<16x8xf32>
    %19 = arith.maximumf %17, %18 : vector<16x8xf32>
    %20 = math.rsqrt %19 : vector<16x8xf32>
    %21 = arith.mulf %15, %20 : vector<16x8xf32>
    %c0_9 = arith.constant 0 : index
    %c0_10 = arith.constant 0 : index
    %c0_11 = arith.constant 0 : index
    %22 = vector.load %arg5[%c0_9, %c0_10, %c0_11] : memref<16x8x128xf32, #tpu.memory_space<vmem>>, vector<16x8x128xf32>
    %23 = arith.mulf %22, %22 : vector<16x8x128xf32>
    %cst_12 = arith.constant dense<0.000000e+00> : vector<16x8xf32>
    %24 = vector.multi_reduction <add>, %23, %cst_12 [2] : vector<16x8x128xf32> to vector<16x8xf32>
    %25 = vector.shape_cast %5 : vector<16x128xf32> to vector<16x1x128xf32>
    %26 = vector.broadcast %25 : vector<16x1x128xf32> to vector<16x8x128xf32>
    %27 = arith.mulf %26, %22 : vector<16x8x128xf32>
    %cst_13 = arith.constant dense<0.000000e+00> : vector<16x8xf32>
    %28 = vector.multi_reduction <add>, %27, %cst_13 [2] : vector<16x8x128xf32> to vector<16x8xf32>
    %29 = vector.broadcast %8 : vector<16x1xf32> to vector<16x8xf32>
    %30 = arith.mulf %29, %24 : vector<16x8xf32>
    %cst_14 = arith.constant 1.000000e-16 : f32
    %31 = vector.broadcast %cst_14 : f32 to vector<16x8xf32>
    %32 = arith.maximumf %30, %31 : vector<16x8xf32>
    %33 = math.rsqrt %32 : vector<16x8xf32>
    %34 = arith.mulf %28, %33 : vector<16x8xf32>
    %35 = math.absf %34 : vector<16x8xf32>
    %36 = vector.broadcast %3 : f32 to vector<16x8xf32>
    %37 = arith.addf %35, %36 : vector<16x8xf32>
    %38 = arith.subf %37, %21 : vector<16x8xf32>
    %cst_15 = arith.constant 0.000000e+00 : f32
    %39 = vector.broadcast %cst_15 : f32 to vector<16x8xf32>
    %40 = arith.maximumf %38, %39 : vector<16x8xf32>
    %c0_16 = arith.constant 0 : index
    %c0_17 = arith.constant 0 : index
    %41 = vector.load %arg7[%c0_16, %c0_17] : memref<16x8xf32, #tpu.memory_space<vmem>>, vector<16x8xf32>
    %42 = arith.addf %41, %40 : vector<16x8xf32>
    %c0_18 = arith.constant 0 : index
    %c0_19 = arith.constant 0 : index
    %43 = vector.load %arg7[%c0_18, %c0_19] : memref<16x8xf32, #tpu.memory_space<vmem>>, vector<16x8xf32>
    tpu.vector_store %arg7[%c0_18, %c0_19], %42 {strides = array<i32>} : memref<16x8xf32, #tpu.memory_space<vmem>>, vector<16x8xf32>,
    %c0_i32_20 = arith.constant 0 : i32
    %44 = arith.cmpi eq, %arg1, %c0_i32_20 : i32
    %45 = arith.extui %44 : i1 to i32
    %c0_i32_21 = arith.constant 0 : i32
    %46 = arith.cmpi ne, %45, %c0_i32_21 : i32
    scf.if %46 {
      %c0_22 = arith.constant 0 : index
      %c0_23 = arith.constant 0 : index
      %47 = vector.load %arg7[%c0_22, %c0_23] : memref<16x8xf32, #tpu.memory_space<vmem>>, vector<16x8xf32>
      %48 = vector.shape_cast %47 : vector<16x8xf32> to vector<1x16x8xf32>
      %cst_24 = arith.constant dense<0.000000e+00> : vector<1xf32>
      %49 = vector.multi_reduction <add>, %48, %cst_24 [1, 2] : vector<1x16x8xf32> to vector<1xf32>
      %50 = vector.shape_cast %49 : vector<1xf32> to vector<1x1x1xf32>
      %51 = vector.extract %50[0, 0, 0] : f32 from vector<1x1x1xf32>
      %52 = vector.broadcast %51 : f32 to vector<1x1xf32>
      %53 = vector.broadcast %4 : f32 to vector<1x1xf32>
      %54 = arith.mulf %52, %53 : vector<1x1xf32>
      %55 = vector.shape_cast %54 : vector<1x1xf32> to vector<1x1x1xf32>
      %56 = vector.shape_cast %55 : vector<1x1x1xf32> to vector<1x1x1xf32>
      %57 = vector.broadcast %56 : vector<1x1x1xf32> to vector<1x8x128xf32>
      %c0_25 = arith.constant 0 : index
      %c0_26 = arith.constant 0 : index
      %c0_27 = arith.constant 0 : index
      %58 = vector.load %arg6[%c0_25, %c0_26, %c0_27] : memref<1x8x128xf32, #tpu.memory_space<vmem>>, vector<1x8x128xf32>
      tpu.vector_store %arg6[%c0_25, %c0_26, %c0_27], %57 {strides = array<i32>} : memref<1x8x128xf32, #tpu.memory_space<vmem>>, vector<1x8x128xf32>,
    } else {
    }
    return
  }
  func.func @transform_0(%arg0: i32, %arg1: i32) -> i32 {
    %c0_i32 = arith.constant 0 : i32
    %c0_i32_0 = arith.constant 0 : i32
    return %c0_i32 : i32
  }
  func.func @transform_1(%arg0: i32, %arg1: i32) -> (i32, i32) {
    %c1_i32 = arith.constant 1 : i32
    %0 = arith.muli %arg0, %c1_i32 : i32
    %1 = arith.addi %0, %arg1 : i32
    %c0_i32 = arith.constant 0 : i32
    %c0_i32_0 = arith.constant 0 : i32
    return %1, %c0_i32 : i32, i32
  }
  func.func @transform_2(%arg0: i32, %arg1: i32) -> (i32, i32, i32) {
    %c1_i32 = arith.constant 1 : i32
    %0 = arith.muli %arg0, %c1_i32 : i32
    %1 = arith.addi %0, %arg1 : i32
    %c0_i32 = arith.constant 0 : i32
    %c0_i32_0 = arith.constant 0 : i32
    %c0_i32_1 = arith.constant 0 : i32
    return %1, %c0_i32, %c0_i32_0 : i32, i32, i32
  }
  func.func @transform_3(%arg0: i32, %arg1: i32) -> (i32, i32, i32) {
    %c1_i32 = arith.constant 1 : i32
    %0 = arith.muli %arg0, %c1_i32 : i32
    %1 = arith.addi %0, %arg1 : i32
    %c0_i32 = arith.constant 0 : i32
    %c0_i32_0 = arith.constant 0 : i32
    %c0_i32_1 = arith.constant 0 : i32
    return %1, %c0_i32, %c0_i32_0 : i32, i32, i32
  }
  func.func @transform_4(%arg0: i32, %arg1: i32) -> (i32, i32, i32) {
    %c0_i32 = arith.constant 0 : i32
    %c0_i32_0 = arith.constant 0 : i32
    %c0_i32_1 = arith.constant 0 : i32
    return %arg0, %c0_i32, %c0_i32_0 : i32, i32, i32
  }
}

</mosaic_0001>

<bundles_post_ra>
// kernel: tpu_custom_call.1
= control target key start
LH: loop header
LB: loop body
LE: loop exit
PB: predicated region body
PF: predicated region fallthrough
CT: control target
= control target key end

     0   :  { %9 = vsyncpa [#allocation6], 0  ;;  %s1989_s0 = inlined_call_operand.hbm [shape: f32[2], index: 0, kind: input, shape index: {}]   ;;  %s1990_s1 = inlined_call_operand.hbm [shape: f32[16,128], index: 1, kind: input, shape index: {}]   ;;  %s1991_s2 = inlined_call_operand.hbm [shape: f32[16,8,128], index: 2, kind: input, shape index: {}]   ;;  %s1992_s3 = inlined_call_operand.hbm [shape: f32[16,8,128], index: 3, kind: input, shape index: {}]   ;;  %s1993_s4 = inlined_call_operand.hbm [shape: f32[1,8,128], index: 4, kind: output, shape index: {}]  }
   0x1   :  { %10 = vsyncpa [#allocation4], 0 }
   0x2   :  { %11 = vsyncpa [#allocation9], 0 }
   0x3   :  { %12 = vsyncpa [#allocation5], 0  ;;  %s1399_s15 = smov [#allocation8]   ;;  %s1400_s17 = smov [#allocation7]  }
   0x4   :  { %s46_s16 = sshll.u32 %s1399_s15, 4  ;;  %s30_s18 = sshll.u32 %s1400_s17, 4  ;;  %s47_s16 = int_to_ptr.vmem [resolvable:$true] %s46_s16  ;;  %s31_s18 = int_to_ptr.vmem [resolvable:$true] %s30_s18 }
   0x5   :  { %s1293_s21 = scalar_lea.hbm %s1991_s2, 2048 }
   0x6   :  { %p1294_p0 = scmp.ne.s32.totalorder %s1991_s2, %s1293_s21  ;;  %p1297_p1 = scmp.lt.u32.totalorder %s1293_s21, %s1991_s2 }
   0x8   :  { %p1299_p2 = pnand %p1297_p1, %p1294_p0 }
   0xa   :  { %1302 = shalt.err (!%p1299_p2)
}
   0xb   :  { %s1303_s26 = scalar_lea.vmem %s47_s16, 2048  ;;  %p1308_p4 = scmp.lt.s32.totalorder %s47_s16, %s47_s16 }
   0xc   :  { %p1304_p3 = scmp.ne.s32.totalorder %s47_s16, %s1303_s26  ;;  %p1309_p5 = scmp.lt.s32.totalorder %s1303_s26, %s1303_s26 }
   0xe   :  { %p1310_p6 = por %p1309_p5, %p1308_p4 }
  0x10   :  { %p1311_p7 = pnand %p1310_p6, %p1304_p3 }
  0x12   :  { %1314 = shalt.err (!%p1311_p7)
}
  0x13   :  { %s1401_s27 = smov 128   ;;  %s1402_s28 = smov 8  }
  0x14   :  { %52 = dma.hbm_to_vmem [thread:$0]  %s1991_s2, 2048, %s47_s16, [#allocation9], %s1401_s27, %s1401_s27, %s1402_s28  }
  0x15   :  { %s1315_s7 = scalar_lea.hbm %s1989_s0, 16 }
  0x16   :  { %p1316_p8 = scmp.ne.s32.totalorder %s1989_s0, %s1315_s7  ;;  %p1319_p9 = scmp.lt.u32.totalorder %s1315_s7, %s1989_s0 }
  0x18   :  { %p1321_p10 = pnand %p1319_p9, %p1316_p8 }
  0x1a   :  { %1324 = shalt.err (!%p1321_p10)
}
  0x1b   :  { %s1403_s12 = smov [#allocation3]   ;;  %s1325_s16 = scalar_lea.hbm %s1990_s1, 256 }
  0x1c   :  { %20 = dma.hbm_to_smem %s1989_s0, 16, %s1403_s12, [#allocation6]  }
  0x1d   :  { %p1326_p11 = scmp.ne.s32.totalorder %s1990_s1, %s1325_s16  ;;  %p1329_p12 = scmp.lt.u32.totalorder %s1325_s16, %s1990_s1 }
  0x1f   :  { %p1331_p13 = pnand %p1329_p12, %p1326_p11 }
  0x21   :  { %1334 = shalt.err (!%p1331_p13)
}
  0x22   :  { %s1335_s22 = scalar_lea.vmem %s31_s18, 256  ;;  %p1340_p1 = scmp.lt.s32.totalorder %s31_s18, %s31_s18 }
  0x23   :  { %p1336_p0 = scmp.ne.s32.totalorder %s31_s18, %s1335_s22  ;;  %p1341_p2 = scmp.lt.s32.totalorder %s1335_s22, %s1335_s22 }
  0x25   :  { %p1342_p3 = por %p1341_p2, %p1340_p1 }
  0x27   :  { %p1343_p4 = pnand %p1342_p3, %p1336_p0 }
  0x29   :  { %1346 = shalt.err (!%p1343_p4)
}
  0x2a   :  { %36 = dma.hbm_to_vmem [thread:$0]  %s1990_s1, 256, %s31_s18, [#allocation4], %s1401_s27, %s1401_s27, %s1402_s28  }
  0x2b   :  { %s1404_s24 = smov [#allocation10]   ;;  %s1347_s30 = scalar_lea.hbm %s1992_s3, 2048 }
  0x2c   :  { %s62_s25 = sshll.u32 %s1404_s24, 4  ;;  %p1348_p5 = scmp.ne.s32.totalorder %s1992_s3, %s1347_s30  ;;  %s63_s25 = int_to_ptr.vmem [resolvable:$true] %s62_s25 }
  0x2d   :  { %p1351_p6 = scmp.lt.u32.totalorder %s1347_s30, %s1992_s3 }
  0x2f   :  { %p1353_p7 = pnand %p1351_p6, %p1348_p5 }
  0x31   :  { %1356 = shalt.err (!%p1353_p7)
}
  0x32   :  { %s1357_s9 = scalar_lea.vmem %s63_s25, 2048  ;;  %p1362_p9 = scmp.lt.s32.totalorder %s63_s25, %s63_s25 }
  0x33   :  { %p1358_p8 = scmp.ne.s32.totalorder %s63_s25, %s1357_s9  ;;  %p1363_p10 = scmp.lt.s32.totalorder %s1357_s9, %s1357_s9 }
  0x35   :  { %p1364_p11 = por %p1363_p10, %p1362_p9 }
  0x37   :  { %p1365_p12 = pnand %p1364_p11, %p1358_p8 }
  0x39   :  { %1368 = shalt.err (!%p1365_p12)
}
  0x3a   :  { %68 = dma.hbm_to_vmem [thread:$0]  %s1992_s3, 2048, %s63_s25, [#allocation9], %s1401_s27, %s1401_s27, %s1402_s28  }
  0x3b   :  { %1391 = dma.done.wait [#allocation6], 16  }
  0x3c   :  { %1392 = vsyncadd [#allocation6], 4294967280 }
  0x3d   :  { %1393 = dma.done.wait [#allocation4], 256  }
  0x3e   :  { %1394 = vsyncadd [#allocation4], 4294967040 }
  0x3f   :  { %1395 = dma.done.wait [#allocation9], 4096  }
  0x40   :  { %1396 = vsyncadd [#allocation9], 4294963200 }
  0x41   :  { %81 = sfence }
  0x42   :  { %v1491_v0 = vld [vmem:[#allocation10 + $0x40] sm:$0xff]  ;;  %v1495_v2 = vld [vmem:[#allocation10 + $0x48] sm:$0xff]  ;;  %v1507_v8 = vld [vmem:[#allocation10 + $0x50] sm:$0xff]  ;;  %v1405_v44 = vmov 1966171168   ;;  %v175_v46 = vlaneseq  ;;  %vm479_vm0 = vcmask 1041409  }
  0x43   :  { %v1493_v1 = vld [vmem:[#allocation10] sm:$0xff]  ;;  %v678_v3 = vmul.f32 %v1491_v0, %v1491_v0  ;;  %v1501_v5 = vld [vmem:[#allocation10 + $0x8] sm:$0xff]  ;;  %v679_v6 = vmul.f32 %v1495_v2, %v1495_v2  ;;  %v1509_v9 = vld [vmem:[#allocation10 + $0x10] sm:$0xff]  ;;  %v680_v10 = vmul.f32 %v1507_v8, %v1507_v8  ;;  %v173_v45 = vunpack.c.l.s4 %v1405_v44  ;;  %s95_s3 = sld [smem:[#allocation3]]  ;;  %s1268_s27 = sld [smem:[#allocation3 + $0x1]] }
  0x44   :  { %v670_v4 = vmul.f32 %v1493_v1, %v1493_v1  ;;  %v671_v7 = vmul.f32 %v1501_v5, %v1501_v5  ;;  %v672_v11 = vmul.f32 %v1509_v9, %v1509_v9  ;;  %v1515_v12 = vld [vmem:[#allocation10 + $0x58] sm:$0xff]  ;;  %v1523_v16 = vld [vmem:[#allocation10 + $0x60] sm:$0xff]  ;;  %v1531_v20 = vld [vmem:[#allocation8 + $0x8] sm:$0xff]  ;;  %v1588_v52 = vshrl.u32 %v175_v46, 7  ;;  %s1408_s28 = smov [#allocation11]  }
  0x45   :  { %702 = vadd.xlane.f32.xlu1 %v678_v3  ;;  %v1517_v13 = vld [vmem:[#allocation10 + $0x18] sm:$0xff]  ;;  %v681_v14 = vmul.f32 %v1515_v12, %v1515_v12  ;;  %v1525_v17 = vld [vmem:[#allocation10 + $0x20] sm:$0xff]  ;;  %v682_v18 = vmul.f32 %v1523_v16, %v1523_v16  ;;  %v122_v22 = vmul.f32 %v1531_v20, %v1531_v20  ;;  %v1539_v24 = vld [vmem:[#allocation8 + $0x48] sm:$0xff]  ;;  %v174_v51 = vunpack.c.0.s8 %v173_v45  ;;  %s1257_s10 = sshll.u32 %s1408_s28, 4  ;;  %s1258_s10 = int_to_ptr.vmem [resolvable:$true] %s1257_s10 }
  0x46   :  { %686 = vadd.xlane.f32.xlu0 %v670_v4  ;;  %v673_v15 = vmul.f32 %v1517_v13, %v1517_v13  ;;  %v674_v19 = vmul.f32 %v1525_v17, %v1525_v17  ;;  %v1533_v21 = vld [vmem:[#allocation8] sm:$0xff]  ;;  %v130_v26 = vmul.f32 %v1539_v24, %v1539_v24  ;;  %v1547_v28 = vld [vmem:[#allocation10 + $0x68] sm:$0xff]  ;;  %v1555_v32 = vld [vmem:[#allocation8 + $0x50] sm:$0xff]  ;;  %vm481_vm1 = vcmask 1042434   ;;  %s1369_s12 = scalar_lea.vmem %s1258_s10, 128  ;;  %p1374_p0 = scmp.lt.s32.totalorder %s1258_s10, %s1258_s10 }
  0x47   :  { %v121_v23 = vmul.f32 %v1533_v21, %v1533_v21  ;;  %v1541_v25 = vld [vmem:[#allocation8 + $0x40] sm:$0xff]  ;;  %v1549_v29 = vld [vmem:[#allocation10 + $0x28] sm:$0xff]  ;;  %v683_v30 = vmul.f32 %v1547_v28, %v1547_v28  ;;  %v1557_v33 = vld [vmem:[#allocation8 + $0x10] sm:$0xff]  ;;  %v131_v34 = vmul.f32 %v1555_v32, %v1555_v32  ;;  %v1599_v57 = vsub.s32 %v174_v51, %v1588_v52  ;;  %p1370_p13 = scmp.ne.s32.totalorder %s1258_s10, %s1369_s12  ;;  %p1375_p1 = scmp.lt.s32.totalorder %s1369_s12, %s1369_s12 }
  0x48   :  { %v129_v27 = vmul.f32 %v1541_v25, %v1541_v25  ;;  %v675_v31 = vmul.f32 %v1549_v29, %v1549_v29  ;;  %v123_v35 = vmul.f32 %v1557_v33, %v1557_v33  ;;  %v1563_v36 = vld [vmem:[#allocation10 + $0x70] sm:$0xff]  ;;  %v1571_v40 = vld [vmem:[#allocation8 + $0x58] sm:$0xff]  ;;  %v1590_v53 = vld [vmem:[#allocation8 + $0x60] sm:$0xff]  ;;  %vm483_vm2 = vcmask 1043459  }
  0x49   :  { %704 = vadd.xlane.f32.xlu1 %v679_v6  ;;  %v1565_v37 = vld [vmem:[#allocation10 + $0x30] sm:$0xff]  ;;  %v684_v38 = vmul.f32 %v1563_v36, %v1563_v36  ;;  %v1573_v41 = vld [vmem:[#allocation8 + $0x18] sm:$0xff]  ;;  %v132_v42 = vmul.f32 %v1571_v40, %v1571_v40  ;;  %v1592_v54 = vld [vmem:[#allocation8 + $0x20] sm:$0xff]  ;;  %v133_v55 = vmul.f32 %v1590_v53, %v1590_v53  ;;  %vm485_vm3 = vcmask 1044484   ;;  %p1376_p2 = por %p1375_p1, %p1374_p0 }
  0x4a   :  { %688 = vadd.xlane.f32.xlu0 %v671_v7  ;;  %v676_v39 = vmul.f32 %v1565_v37, %v1565_v37  ;;  %v124_v43 = vmul.f32 %v1573_v41, %v1573_v41  ;;  %v1579_v47 = vld [vmem:[#allocation10 + $0x78] sm:$0xff]  ;;  %v125_v56 = vmul.f32 %v1592_v54, %v1592_v54  ;;  %v1601_v58 = vld [vmem:[#allocation8 + $0x68] sm:$0xff]  ;;  %v97_v60 = vld [vmem:[#allocation7] sm:$0xff]  ;;  %vm487_vm4 = vcmask 1045509  }
  0x4b   :  { %v1581_v48 = vld [vmem:[#allocation10 + $0x38] sm:$0xff]  ;;  %v685_v49 = vmul.f32 %v1579_v47, %v1579_v47  ;;  %v1603_v59 = vld [vmem:[#allocation8 + $0x28] sm:$0xff]  ;;  %v134_v61 = vmul.f32 %v1601_v58, %v1601_v58  ;;  %v178_v3 = vrot.slane %v97_v60, %v1599_v57  ;;  %v99_v7 = vmul.f32 %v97_v60, %v97_v60  ;;  %p1377_p3 = pnand %p1376_p2, %p1370_p13 }
  0x4c   :  { %v677_v50 = vmul.f32 %v1581_v48, %v1581_v48  ;;  %v126_v62 = vmul.f32 %v1603_v59, %v1603_v59  ;;  %v98_v63 = vld [vmem:[#allocation7 + $0x8] sm:$0xff]  ;;  %v171_v44 = vcombine.high %v97_v60, %v97_v60  ;;  %vm489_vm5 = vcmask 1046534  }
  0x4d   :  { %706 = vadd.xlane.f32.xlu1 %v680_v10  ;;  %v100_v4 = vmul.f32 %v98_v63, %v98_v63  ;;  %v227_v6 = vrot.slane %v98_v63, %v1599_v57  ;;  %v1611_v10 = vld [vmem:[#allocation8 + $0x70] sm:$0xff]  ;;  %vm491_vm6 = vcmask 1047559   ;;  %vm92_vm7 = vcmask 64512  }
  0x4e   :  { %690 = vadd.xlane.f32.xlu0 %v672_v11  ;;  %v1613_v11 = vld [vmem:[#allocation8 + $0x30] sm:$0xff]  ;;  %v185_v60 = vrot.slane %v171_v44, %v1599_v57 }
  0x51   :  { %708 = vadd.xlane.f32.xlu1 %v681_v14  ;;  %v186_v14 = vcombine.high %v178_v3, %v178_v3 }
  0x52   :  { %692 = vadd.xlane.f32.xlu0 %v673_v15  ;;  %v135_v15 = vmul.f32 %v1611_v10, %v1611_v10 }
  0x55   :  { %710 = vadd.xlane.f32.xlu1 %v682_v18  ;;  %v127_v18 = vmul.f32 %v1613_v11, %v1613_v11 }
  0x56   :  { %694 = vadd.xlane.f32.xlu0 %v674_v19  ;;  %v1620_v19 = vsub.s32 0, %v1588_v52 }
  0x59   :  { %139 = vadd.xlane.f32.xlu1 %v122_v22  ;;  %v1622_v22 = vld [vmem:[#allocation8 + $0x78] sm:$0xff] }
  0x5a   :  { %137 = vadd.xlane.f32.xlu0 %v121_v23  ;;  %v1624_v23 = vld [vmem:[#allocation8 + $0x38] sm:$0xff] }
  0x5d   :  { %155 = vadd.xlane.f32.xlu1 %v130_v26  ;;  %v208_v26 = vrot.slane %v186_v14, %v1599_v57 }
  0x5e   :  { %153 = vadd.xlane.f32.xlu0 %v129_v27  ;;  %v194_v27 = vrot.slane %v178_v3, %v1599_v57 }
  0x61   :  { %712 = vadd.xlane.f32.xlu1 %v683_v30  ;;  %v235_v30 = vcombine.high %v227_v6, %v227_v6 }
  0x62   :  { %696 = vadd.xlane.f32.xlu0 %v675_v31  ;;  %v136_v31 = vmul.f32 %v1622_v22, %v1622_v22 }
  0x65   :  { %157 = vadd.xlane.f32.xlu1 %v131_v34  ;;  %v128_v34 = vmul.f32 %v1624_v23, %v1624_v23 }
  0x66   :  { %141 = vadd.xlane.f32.xlu0 %v123_v35  ;;  %v243_v35 = vrot.slane %v227_v6, %v1599_v57 }
  0x68   :  { %v304_v45 = vrot.slane %v243_v35, %v1620_v19 }
  0x69   :  { %714 = vadd.xlane.f32.xlu1 %v684_v38  ;;  %v276_v38 = vrot.slane %v208_v26, %v1620_v19 }
  0x6a   :  { %698 = vadd.xlane.f32.xlu0 %v676_v39  ;;  %v272_v39 = vrot.slane %v194_v27, %v1620_v19 }
  0x6b   :  { %v719_v51 = vmul.f32 %v1501_v5, %v276_v38  ;;  %v218_v5 = vcombine.high %v208_v26, %v208_v26 }
  0x6d   :  { %159 = vadd.xlane.f32.xlu1 %v132_v42  ;;  %v257_v42 = vrot.slane %v235_v30, %v1599_v57 }
  0x6e   :  { %143 = vadd.xlane.f32.xlu0 %v124_v43  ;;  %v220_v43 = vcombine.high %v98_v63, %v98_v63 }
  0x6f   :  { %v267_v63 = vcombine.high %v257_v42, %v257_v42 }
  0x71   :  { %716 = vadd.xlane.f32.xlu1 %v685_v49  ;;  %v265_v49 = vcombine.high %v243_v35, %v243_v35  ;;  %v350_v35 = vmul.f32 %v276_v38, %v1531_v20 }
  0x72   :  { %700 = vadd.xlane.f32.xlu0 %v677_v50  ;;  %v216_v50 = vcombine.high %v194_v27, %v194_v27 }
  0x73   :  { %v312_v3 = vrot.slane %v265_v49, %v1620_v19 }
  0x74   :  { %v280_v6 = vrot.slane %v216_v50, %v1620_v19 }
  0x75   :  { %161 = vadd.xlane.f32.xlu1 %v133_v55  ;;  %v718_v55 = vmul.f32 %v1493_v1, %v272_v39  ;;  %v728_v1 = vmul.f32 %v1507_v8, %v312_v3 }
  0x76   :  { %145 = vadd.xlane.f32.xlu0 %v125_v56  ;;  %v308_v56 = vrot.slane %v257_v42, %v1620_v19  ;;  %v349_v42 = vmul.f32 %v272_v39, %v1533_v21 }
  0x79   :  { %163 = vadd.xlane.f32.xlu1 %v134_v61  ;;  %v234_v61 = vrot.slane %v220_v43, %v1599_v57  ;;  %v358_v43 = vmul.f32 %v308_v56, %v1539_v24  ;;  %v359_v24 = vmul.f32 %v312_v3, %v1555_v32 }
  0x7a   :  { %147 = vadd.xlane.f32.xlu0 %v126_v62  ;;  %v726_v62 = vmul.f32 %v1491_v0, %v304_v45  ;;  %v720_v0 = vmul.f32 %v1509_v9, %v280_v6 }
  0x7b   :  { %v250_v14 = vrot.slane %v234_v61, %v1599_v57 }
  0x7d   :  { %103 = vadd.xlane.f32.xlu1 %v100_v4  ;;  %v727_v4 = vmul.f32 %v1495_v2, %v308_v56  ;;  %v320_v27 = vrot.slane %v250_v14, %v1620_v19  ;;  %v266_v49 = vcombine.high %v250_v14, %v250_v14 }
  0x7e   :  { %101 = vadd.xlane.f32.xlu0 %v99_v7  ;;  %v316_v7 = vrot.slane %v267_v63, %v1620_v19 }
  0x7f   :  { %v730_v30 = vmul.f32 %v1523_v16, %v320_v27  ;;  %v357_v16 = vmul.f32 %v304_v45, %v1541_v25  ;;  %v351_v25 = vmul.f32 %v280_v6, %v1557_v33 }
  0x80   :  { %v729_v2 = vmul.f32 %v1515_v12, %v316_v7 }
  0x81   :  { %165 = vadd.xlane.f32.xlu1 %v135_v15  ;;  %v284_v15 = vrot.slane %v218_v5, %v1620_v19 }
  0x82   :  { %149 = vadd.xlane.f32.xlu0 %v127_v18  ;;  %v201_v18 = vrot.slane %v185_v60, %v1599_v57 }
  0x83   :  { %v721_v8 = vmul.f32 %v1517_v13, %v284_v15 }
  0x84   :  { %v288_v26 = vrot.slane %v201_v18, %v1620_v19  ;;  %v217_v38 = vcombine.high %v201_v18, %v201_v18 }
  0x85   :  { %167 = vadd.xlane.f32.xlu1 %v136_v31  ;;  %v236_v31 = vcombine.high %v234_v61, %v234_v61 }
  0x86   :  { %151 = vadd.xlane.f32.xlu0 %v128_v34  ;;  %v722_v9 = vmul.f32 %v1525_v17, %v288_v26  ;;  %v187_v34 = vcombine.high %v185_v60, %v185_v60  ;;  %v296_v39 = vrot.slane %v217_v38, %v1620_v19 }
  0x87   :  { %v264_v12 = vrot.slane %v236_v31, %v1599_v57 }
  0x88   :  { %v215_v13 = vrot.slane %v187_v34, %v1599_v57  ;;  %v328_v57 = vrot.slane %v266_v49, %v1620_v19  ;;  %v724_v50 = vmul.f32 %v1565_v37, %v296_v39  ;;  %v361_v37 = vmul.f32 %v320_v27, %v1590_v53 }
  0x89   :  { %736 = vadd.xlane.f32.xlu1 %v719_v51  ;;  %v324_v17 = vrot.slane %v264_v12, %v1620_v19 }
  0x8a   :  { %734 = vadd.xlane.f32.xlu0 %v718_v55  ;;  %v292_v44 = vrot.slane %v215_v13, %v1620_v19  ;;  %v732_v45 = vmul.f32 %v1563_v36, %v328_v57  ;;  %v219_v51 = vcombine.high %v215_v13, %v215_v13  ;;  %v352_v55 = vmul.f32 %v284_v15, %v1573_v41 }
  0x8b   :  { %v731_v20 = vmul.f32 %v1547_v28, %v324_v17  ;;  %v268_v28 = vcombine.high %v264_v12, %v264_v12  ;;  %v362_v41 = vmul.f32 %v324_v17, %v1601_v58 }
  0x8c   :  { %v723_v21 = vmul.f32 %v1549_v29, %v292_v44  ;;  %v360_v29 = vmul.f32 %v316_v7, %v1571_v40  ;;  %v300_v33 = vrot.slane %v219_v51, %v1620_v19  ;;  %v353_v40 = vmul.f32 %v288_v26, %v1592_v54 }
  0x8d   :  { %752 = vadd.xlane.f32.xlu1 %v727_v4  ;;  %v332_v32 = vrot.slane %v268_v28, %v1620_v19  ;;  %v354_v61 = vmul.f32 %v292_v44, %v1603_v59 }
  0x8e   :  { %750 = vadd.xlane.f32.xlu0 %v726_v62  ;;  %v725_v56 = vmul.f32 %v1581_v48, %v300_v33  ;;  %v363_v62 = vmul.f32 %v328_v57, %v1611_v10  ;;  %v356_v53 = vmul.f32 %v300_v33, %v1624_v23 }
  0x8f   :  { %v733_v36 = vmul.f32 %v1579_v47, %v332_v32  ;;  %v355_v47 = vmul.f32 %v296_v39, %v1613_v11  ;;  %v364_v48 = vmul.f32 %v332_v32, %v1622_v22 }
  0x91   :  { %754 = vadd.xlane.f32.xlu1 %v728_v1 }
  0x92   :  { %738 = vadd.xlane.f32.xlu0 %v720_v0 }
  0x95   :  { %756 = vadd.xlane.f32.xlu1 %v729_v2  ;;  %v414_v2 = vand.u32 127, %v175_v46 }
  0x96   :  { %740 = vadd.xlane.f32.xlu0 %v721_v8 }
  0x99   :  { %758 = vadd.xlane.f32.xlu1 %v730_v30  ;;  %v1706_v30 = vsub.s32 %v414_v2, %v1588_v52 }
  0x9a   :  { %742 = vadd.xlane.f32.xlu0 %v722_v9 }
  0x9d   :  { %367 = vadd.xlane.f32.xlu1 %v350_v35 }
  0x9e   :  { %365 = vadd.xlane.f32.xlu0 %v349_v42 }
  0xa1   :  { %383 = vadd.xlane.f32.xlu1 %v358_v43 }
  0xa2   :  { %381 = vadd.xlane.f32.xlu0 %v357_v16 }
  0xa5   :  { %760 = vadd.xlane.f32.xlu1 %v731_v20 }
  0xa6   :  { %744 = vadd.xlane.f32.xlu0 %v723_v21 }
  0xa9   :  { %385 = vadd.xlane.f32.xlu1 %v359_v24 }
  0xaa   :  { %369 = vadd.xlane.f32.xlu0 %v351_v25 }
  0xad   :  { %762 = vadd.xlane.f32.xlu1 %v732_v45 }
  0xae   :  { %746 = vadd.xlane.f32.xlu0 %v724_v50 }
  0xb1   :  { %387 = vadd.xlane.f32.xlu1 %v360_v29 }
  0xb2   :  { %371 = vadd.xlane.f32.xlu0 %v352_v55 }
  0xb5   :  { %764 = vadd.xlane.f32.xlu1 %v733_v36 }
  0xb6   :  { %748 = vadd.xlane.f32.xlu0 %v725_v56 }
  0xb9   :  { %389 = vadd.xlane.f32.xlu1 %v361_v37 }
  0xba   :  { %373 = vadd.xlane.f32.xlu0 %v353_v40 }
  0xbd   :  { %391 = vadd.xlane.f32.xlu1 %v362_v41 }
  0xbe   :  { %375 = vadd.xlane.f32.xlu0 %v354_v61 }
  0xc1   :  { %393 = vadd.xlane.f32.xlu1 %v363_v62 }
  0xc2   :  { %377 = vadd.xlane.f32.xlu0 %v355_v47 }
  0xc5   :  { %395 = vadd.xlane.f32.xlu1 %v364_v48 }
  0xc6   :  { %379 = vadd.xlane.f32.xlu0 %v356_v53 }
  0xd2   :  { %v703_v54 = vpop.xlane.xlu1 %702 }
  0xd3   :  { %v687_v3 = vpop.xlane.xlu0 %686  ;;  %v817_v34 = vrot.slane %v703_v54, %v1706_v30 }
  0xd4   :  { %v785_v13 = vrot.slane %v687_v3, %v1706_v30 }
  0xd6   :  { %v705_v63 = vpop.xlane.xlu1 %704 }
  0xd7   :  { %v689_v58 = vpop.xlane.xlu0 %688  ;;  %v821_v35 = vrot.slane %v705_v63, %v1706_v30 }
  0xd8   :  { %v789_v42 = vrot.slane %v689_v58, %v1706_v30 }
  0xd9   :  { %v853_v21 = vsel %vm479_vm0, %v821_v35, %v817_v34 }
  0xda   :  { %v707_v60 = vpop.xlane.xlu1 %706  ;;  %v846_v38 = vsel %vm479_vm0, %v789_v42, %v785_v13 }
  0xdb   :  { %v691_v59 = vpop.xlane.xlu0 %690  ;;  %v825_v12 = vrot.slane %v707_v60, %v1706_v30 }
  0xdc   :  { %v793_v46 = vrot.slane %v691_v59, %v1706_v30 }
  0xdd   :  { %v854_v25 = vsel %vm481_vm1, %v825_v12, %v853_v21 }
  0xde   :  { %v709_v4 = vpop.xlane.xlu1 %708  ;;  %v847_v39 = vsel %vm481_vm1, %v793_v46, %v846_v38 }
  0xdf   :  { %v693_v6 = vpop.xlane.xlu0 %692  ;;  %v829_v43 = vrot.slane %v709_v4, %v1706_v30 }
  0xe0   :  { %v797_v16 = vrot.slane %v693_v6, %v1706_v30 }
  0xe1   :  { %v855_v28 = vsel %vm483_vm2, %v829_v43, %v854_v25 }
  0xe2   :  { %v711_v5 = vpop.xlane.xlu1 %710  ;;  %v848_v51 = vsel %vm483_vm2, %v797_v16, %v847_v39 }
  0xe3   :  { %v695_v10 = vpop.xlane.xlu0 %694  ;;  %v833_v49 = vrot.slane %v711_v5, %v1706_v30 }
  0xe4   :  { %v801_v20 = vrot.slane %v695_v10, %v1706_v30 }
  0xe5   :  { %v856_v36 = vsel %vm485_vm3, %v833_v49, %v855_v28  ;;  %v526_v28 = vsub.s32 2, %v1588_v52 }
  0xe6   :  { %v1688_v1 = vpop.xlane.xlu1 %139  ;;  %v849_v56 = vsel %vm485_vm3, %v801_v20, %v848_v51 }
  0xe7   :  { %v1690_v11 = vpop.xlane.xlu0 %137  ;;  %v422_v54 = vrot.slane %v1688_v1, %v1706_v30 }
  0xe8   :  { %v418_v3 = vrot.slane %v1690_v11, %v1706_v30 }
  0xea   :  { %v1692_v7 = vpop.xlane.xlu1 %155 }
  0xeb   :  { %v1694_v22 = vpop.xlane.xlu0 %153  ;;  %v454_v59 = vrot.slane %v1692_v7, %v1706_v30 }
  0xec   :  { %v450_v4 = vrot.slane %v1694_v22, %v1706_v30 }
  0xee   :  { %v713_v23 = vpop.xlane.xlu1 %712  ;;  %v493_v2 = vsel %vm479_vm0, %v454_v59, %v450_v4 }
  0xef   :  { %v697_v14 = vpop.xlane.xlu0 %696  ;;  %v837_v57 = vrot.slane %v713_v23, %v1706_v30 }
  0xf0   :  { %v805_v24 = vrot.slane %v697_v14, %v1706_v30 }
  0xf1   :  { %v857_v37 = vsel %vm487_vm4, %v837_v57, %v856_v36  ;;  %v519_v57 = vsub.s32 1, %v1588_v52 }
  0xf2   :  { %v1696_v0 = vpop.xlane.xlu1 %157  ;;  %v850_v40 = vsel %vm487_vm4, %v805_v24, %v849_v56 }
  0xf3   :  { %v1698_v15 = vpop.xlane.xlu0 %141  ;;  %v458_v10 = vrot.slane %v1696_v0, %v1706_v30 }
  0xf4   :  { %v426_v60 = vrot.slane %v1698_v15, %v1706_v30  ;;  %v480_v15 = vsel %vm479_vm0, %v422_v54, %v418_v3 }
  0xf6   :  { %v715_v18 = vpop.xlane.xlu1 %714  ;;  %v482_v22 = vsel %vm481_vm1, %v426_v60, %v480_v15 }
  0xf7   :  { %v699_v27 = vpop.xlane.xlu0 %698  ;;  %v841_v45 = vrot.slane %v715_v18, %v1706_v30 }
  0xf8   :  { %v809_v50 = vrot.slane %v699_v27, %v1706_v30 }
  0xf9   :  { %v858_v41 = vsel %vm489_vm5, %v841_v45, %v857_v37  ;;  %v1795_v37 = vsub.s32 4, %v1588_v52 }
  0xfa   :  { %v1701_v8 = vpop.xlane.xlu1 %159  ;;  %v851_v61 = vsel %vm489_vm5, %v809_v50, %v850_v40 }
  0xfb   :  { %v1703_v26 = vpop.xlane.xlu0 %143  ;;  %v462_v7 = vrot.slane %v1701_v8, %v1706_v30 }
  0xfc   :  { %v430_v6 = vrot.slane %v1703_v26, %v1706_v30 }
  0xfe   :  { %v717_v9 = vpop.xlane.xlu1 %716  ;;  %v484_v26 = vsel %vm483_vm2, %v430_v6, %v482_v22  ;;  %v561_v22 = vsub.s32 7, %v1588_v52 }
  0xff   :  { %v701_v31 = vpop.xlane.xlu0 %700  ;;  %v845_v29 = vrot.slane %v717_v9, %v1706_v30 }
 0x100   :  { %v813_v55 = vrot.slane %v701_v31, %v1706_v30  ;;  %v494_v31 = vsel %vm481_vm1, %v458_v10, %v493_v2 }
 0x101   :  { %v859_v62 = vsel %vm491_vm6, %v845_v29, %v858_v41  ;;  %v495_v12 = vsel %vm483_vm2, %v462_v7, %v494_v31 }
 0x102   :  { %v1716_v17 = vpop.xlane.xlu1 %161  ;;  %v852_v48 = vsel %vm491_vm6, %v813_v55, %v851_v61 }
 0x103   :  { %v146_v44 = vpop.xlane.xlu0 %145  ;;  %v466_v27 = vrot.slane %v1716_v17, %v1706_v30 }
 0x104   :  { %v434_v1 = vrot.slane %v146_v44, %v1706_v30 }
 0x105   :  { %v496_v16 = vsel %vm485_vm3, %v466_v27, %v495_v12 }
 0x106   :  { %v164_v32 = vpop.xlane.xlu1 %163  ;;  %v486_v8 = vsel %vm485_vm3, %v434_v1, %v484_v26  ;;  %v554_v1 = vsub.s32 6, %v1588_v52 }
 0x107   :  { %v148_v33 = vpop.xlane.xlu0 %147  ;;  %v470_v9 = vrot.slane %v164_v32, %v1706_v30 }
 0x108   :  { %v438_v18 = vrot.slane %v148_v33, %v1706_v30  ;;  %v533_v33 = vsub.s32 3, %v1588_v52 }
 0x109   :  { %v497_v44 = vsel %vm487_vm4, %v470_v9, %v496_v16 }
 0x10a   :  { %v104_v47 = vpop.xlane.xlu1 %103  ;;  %v488_v46 = vsel %vm487_vm4, %v438_v18, %v486_v8 }
 0x10b   :  { %v102_v53 = vpop.xlane.xlu0 %101  ;;  %v863_v63 = vmul.f32 %v859_v62, %v104_v47  ;;  %v1406_v62 = vmov 0  }
 0x10c   :  { %v862_v58 = vmul.f32 %v852_v48, %v102_v53  ;;  %1281 = vset.pattern.permute.xlu0 %v1406_v62  ;;  %1282 = vset.pattern.permute.xlu1 %v1406_v62 }
 0x10d   :  { %v865_v11 = vmax.f32 %v863_v63, 1e-16  ;;  %v547_v63 = vsub.s32 5, %v1588_v52 }
 0x10e   :  { %v864_v5 = vmax.f32 %v862_v58, 1e-16  ;;  %v166_v23 = vpop.xlane.xlu1 %165 }
 0x10f   :  { %v150_v14 = vpop.xlane.xlu0 %149  ;;  %v474_v34 = vrot.slane %v166_v23, %v1706_v30 }
 0x110   :  { %1285 = vrsqrt.f32 %v864_v5  ;;  %v442_v0 = vrot.slane %v150_v14, %v1706_v30 }
 0x111   :  { %1287 = vrsqrt.f32 %v865_v11  ;;  %v498_v20 = vsel %vm489_vm5, %v474_v34, %v497_v44 }
 0x112   :  { %v168_v35 = vpop.xlane.xlu1 %167  ;;  %v490_v17 = vsel %vm489_vm5, %v442_v0, %v488_v46 }
 0x113   :  { %v152_v42 = vpop.xlane.xlu0 %151  ;;  %v478_v13 = vrot.slane %v168_v35, %v1706_v30 }
 0x114   :  { %v446_v43 = vrot.slane %v152_v42, %v1706_v30 }
 0x115   :  { %v499_v38 = vsel %vm491_vm6, %v478_v13, %v498_v20 }
 0x116   :  { %v492_v49 = vsel %vm491_vm6, %v446_v43, %v490_v17  ;;  %v503_v25 = vmul.f32 %v499_v38, %v104_v47  ;;  %v1812_v58 = vpop.xlane.xlu1 %736 }
 0x117   :  { %v502_v21 = vmul.f32 %v492_v49, %v102_v53  ;;  %v1814_v60 = vpop.xlane.xlu0 %734 }
 0x118   :  { %v505_v29 = vmax.f32 %v503_v25, 1e-16 }
 0x119   :  { %v504_v39 = vmax.f32 %v502_v21, 1e-16 }
 0x11a   :  { %v1780_v24 = vpop.eup %1285  ;;  %v1818_v6 = vpop.xlane.xlu1 %752 }
 0x11b   :  { %v880_v45 = vrot.slane %v1780_v24, %v519_v57  ;;  %v873_v50 = vrot.slane %v1780_v24, %v1620_v19  ;;  %v1786_v51 = vpop.eup %1287  ;;  %1289 = vrsqrt.f32 %v504_v39  ;;  %v887_v32 = vrot.slane %v1780_v24, %v526_v28  ;;  %v1820_v5 = vpop.xlane.xlu0 %750 }
 0x11c   :  { %v929_v55 = vrot.slane %v1786_v51, %v1620_v19  ;;  %1291 = vrsqrt.f32 %v505_v29  ;;  %v936_v36 = vrot.slane %v1786_v51, %v519_v57  ;;  %v894_v56 = vrot.slane %v1780_v24, %v533_v33 }
 0x11d   :  { %882 = vbcast.lane.b32.xlu1 %v880_v45, 256  ;;  %875 = vbcast.lane.b32.xlu0 %v873_v50, 256  ;;  %v943_v40 = vrot.slane %v1786_v51, %v526_v28  ;;  %v901_v41 = vrot.slane %v1780_v24, %v1795_v37  ;;  %v950_v47 = vrot.slane %v1786_v51, %v533_v33 }
 0x11e   :  { %v957_v54 = vrot.slane %v1786_v51, %v1795_v37  ;;  %v908_v4 = vrot.slane %v1780_v24, %v547_v63  ;;  %v964_v11 = vrot.slane %v1786_v51, %v547_v63  ;;  %v915_v23 = vrot.slane %v1780_v24, %v554_v1  ;;  %v1827_v14 = vpop.xlane.xlu1 %754 }
 0x11f   :  { %v1829_v15 = vpop.xlane.xlu0 %738  ;;  %v971_v2 = vrot.slane %v1786_v51, %v554_v1  ;;  %v922_v26 = vrot.slane %v1780_v24, %v561_v22  ;;  %v978_v34 = vrot.slane %v1786_v51, %v561_v22 }
 0x121   :  { %931 = vbcast.lane.b32.xlu1 %v929_v55, 256  ;;  %889 = vbcast.lane.b32.xlu0 %v887_v32, 256 }
 0x122   :  { %v1834_v27 = vpop.xlane.xlu1 %756 }
 0x123   :  { %v1836_v0 = vpop.xlane.xlu0 %740 }
 0x125   :  { %938 = vbcast.lane.b32.xlu1 %v936_v36, 256  ;;  %896 = vbcast.lane.b32.xlu0 %v894_v56, 256  ;;  %v1800_v61 = vpop.eup %1289 }
 0x126   :  { %v513_v48 = vrot.slane %v1800_v61, %v1620_v19  ;;  %v1805_v53 = vpop.eup %1291  ;;  %v520_v59 = vrot.slane %v1800_v61, %v519_v57  ;;  %v527_v10 = vrot.slane %v1800_v61, %v526_v28  ;;  %v534_v18 = vrot.slane %v1800_v61, %v533_v33  ;;  %v1843_v8 = vpop.xlane.xlu1 %758 }
 0x127   :  { %v569_v3 = vrot.slane %v1805_v53, %v1620_v19  ;;  %v576_v19 = vrot.slane %v1805_v53, %v519_v57  ;;  %v583_v7 = vrot.slane %v1805_v53, %v526_v28  ;;  %v590_v9 = vrot.slane %v1805_v53, %v533_v33  ;;  %v1845_v52 = vpop.xlane.xlu0 %742 }
 0x128   :  { %v541_v31 = vrot.slane %v1800_v61, %v1795_v37  ;;  %v548_v35 = vrot.slane %v1800_v61, %v547_v63  ;;  %v597_v46 = vrot.slane %v1805_v53, %v1795_v37  ;;  %v555_v13 = vrot.slane %v1800_v61, %v554_v1 }
 0x129   :  { %945 = vbcast.lane.b32.xlu1 %v943_v40, 256  ;;  %903 = vbcast.lane.b32.xlu0 %v901_v41, 256  ;;  %v604_v43 = vrot.slane %v1805_v53, %v547_v63  ;;  %v562_v16 = vrot.slane %v1800_v61, %v561_v22  ;;  %v611_v49 = vrot.slane %v1805_v53, %v554_v1 }
 0x12a   :  { %v1849_v42 = vpop.xlane.xlu1 %367  ;;  %v618_v38 = vrot.slane %v1805_v53, %v561_v22 }
 0x12b   :  { %v366_v12 = vpop.xlane.xlu0 %365 }
 0x12d   :  { %952 = vbcast.lane.b32.xlu1 %v950_v47, 256  ;;  %515 = vbcast.lane.b32.xlu0 %v513_v48, 256 }
 0x12e   :  { %v1856_v17 = vpop.xlane.xlu1 %383 }
 0x12f   :  { %v382_v44 = vpop.xlane.xlu0 %381 }
 0x131   :  { %959 = vbcast.lane.b32.xlu1 %v957_v54, 256  ;;  %571 = vbcast.lane.b32.xlu0 %v569_v3, 256 }
 0x132   :  { %v1859_v20 = vpop.xlane.xlu1 %760 }
 0x133   :  { %v1861_v21 = vpop.xlane.xlu0 %744 }
 0x135   :  { %522 = vbcast.lane.b32.xlu1 %v520_v59, 256  ;;  %910 = vbcast.lane.b32.xlu0 %v908_v4, 256  ;;  %v1895_v4 = vstv %s95_s3 }
 0x136   :  { %v1864_v57 = vpop.xlane.xlu1 %385 }
 0x137   :  { %v370_v24 = vpop.xlane.xlu0 %369 }
 0x139   :  { %578 = vbcast.lane.b32.xlu1 %v576_v19, 256  ;;  %529 = vbcast.lane.b32.xlu0 %v527_v10, 256 }
 0x13a   :  { %v1866_v25 = vpop.xlane.xlu1 %762 }
 0x13b   :  { %v1868_v39 = vpop.xlane.xlu0 %746 }
 0x13d   :  { %966 = vbcast.lane.b32.xlu1 %v964_v11, 256  ;;  %917 = vbcast.lane.b32.xlu0 %v915_v23, 256 }
 0x13e   :  { %v1870_v45 = vpop.xlane.xlu1 %387 }
 0x13f   :  { %v1872_v50 = vpop.xlane.xlu0 %371 }
 0x141   :  { %585 = vbcast.lane.b32.xlu1 %v583_v7, 256  ;;  %536 = vbcast.lane.b32.xlu0 %v534_v18, 256 }
 0x142   :  { %v1874_v28 = vpop.xlane.xlu1 %764 }
 0x143   :  { %v1876_v51 = vpop.xlane.xlu0 %748 }
 0x145   :  { %973 = vbcast.lane.b32.xlu1 %v971_v2, 256  ;;  %924 = vbcast.lane.b32.xlu0 %v922_v26, 256 }
 0x146   :  { %v1878_v29 = vpop.xlane.xlu1 %389 }
 0x147   :  { %v1880_v55 = vpop.xlane.xlu0 %373 }
 0x149   :  { %592 = vbcast.lane.b32.xlu1 %v590_v9, 256  ;;  %543 = vbcast.lane.b32.xlu0 %v541_v31, 256 }
 0x14a   :  { %v1882_v32 = vpop.xlane.xlu1 %391 }
 0x14b   :  { %v1884_v33 = vpop.xlane.xlu0 %375 }
 0x14d   :  { %980 = vbcast.lane.b32.xlu1 %v978_v34, 256  ;;  %550 = vbcast.lane.b32.xlu0 %v548_v35, 256 }
 0x14e   :  { %v1886_v36 = vpop.xlane.xlu1 %393 }
 0x14f   :  { %v1888_v56 = vpop.xlane.xlu0 %377 }
 0x151   :  { %599 = vbcast.lane.b32.xlu1 %v597_v46, 256  ;;  %557 = vbcast.lane.b32.xlu0 %v555_v13, 256 }
 0x152   :  { %v1890_v37 = vpop.xlane.xlu1 %395 }
 0x153   :  { %v1892_v40 = vpop.xlane.xlu0 %379 }
 0x155   :  { %606 = vbcast.lane.b32.xlu1 %v604_v43, 256  ;;  %564 = vbcast.lane.b32.xlu0 %v562_v16, 256 }
 0x159   :  { %613 = vbcast.lane.b32.xlu1 %v611_v49, 256 }
 0x15d   :  { %620 = vbcast.lane.b32.xlu1 %v618_v38, 256 }
 0x18f   :  { %v883_v41 = vpop.permute.xlu1 %882  ;;  %v876_v61 = vpop.permute.xlu0 %875 }
 0x190   :  { %v998_v54 = vmul.f32 %v876_v61, %v1814_v60  ;;  %v999_v1 = vmul.f32 %v883_v41, %v1812_v58 }
 0x192   :  { %v1014_v59 = vand.u32 2147483647, %v998_v54  ;;  %v1015_v60 = vand.u32 2147483647, %v999_v1 }
 0x193   :  { %v932_v62 = vpop.permute.xlu1 %931  ;;  %v890_v47 = vpop.permute.xlu0 %889 }
 0x194   :  { %v1031_v11 = vadd.f32 %v1895_v4, %v1014_v59  ;;  %v1006_v7 = vmul.f32 %v932_v62, %v1820_v5  ;;  %v1000_v34 = vmul.f32 %v890_v47, %v1829_v15  ;;  %v1032_v58 = vadd.f32 %v1895_v4, %v1015_v60 }
 0x196   :  { %v1022_v31 = vand.u32 2147483647, %v1006_v7  ;;  %v1016_v16 = vand.u32 2147483647, %v1000_v34 }
 0x197   :  { %v939_v48 = vpop.permute.xlu1 %938  ;;  %v897_v53 = vpop.permute.xlu0 %896 }
 0x198   :  { %v1007_v22 = vmul.f32 %v939_v48, %v1818_v6  ;;  %v1039_v5 = vadd.f32 %v1895_v4, %v1022_v31  ;;  %v1001_v38 = vmul.f32 %v897_v53, %v1836_v0 }
 0x19a   :  { %v1023_v35 = vand.u32 2147483647, %v1007_v22  ;;  %v1017_v59 = vand.u32 2147483647, %v1001_v38 }
 0x19b   :  { %v946_v3 = vpop.permute.xlu1 %945  ;;  %v904_v63 = vpop.permute.xlu0 %903 }
 0x19c   :  { %v1040_v49 = vadd.f32 %v1895_v4, %v1023_v35  ;;  %v1008_v41 = vmul.f32 %v946_v3, %v1827_v14  ;;  %v1034_v14 = vadd.f32 %v1895_v4, %v1017_v59 }
 0x19f   :  { %v953_v19 = vpop.permute.xlu1 %952  ;;  %v516_v10 = vpop.permute.xlu0 %515 }
 0x1a0   :  { %v638_v23 = vmul.f32 %v516_v10, %v366_v12  ;;  %v1024_v10 = vand.u32 2147483647, %v1008_v41 }
 0x1a2   :  { %v1047_v18 = vsub.f32 %v1031_v11, %v638_v23  ;;  %v1041_v53 = vadd.f32 %v1895_v4, %v1024_v10 }
 0x1a3   :  { %v960_v2 = vpop.permute.xlu1 %959  ;;  %v572_v26 = vpop.permute.xlu0 %571 }
 0x1a4   :  { %v1063_v9 = vmax.f32 %v1047_v18, 0.0  ;;  %v646_v43 = vmul.f32 %v572_v26, %v382_v44  ;;  %v1033_v44 = vadd.f32 %v1895_v4, %v1016_v16  ;;  %v1009_v18 = vmul.f32 %v953_v19, %v1834_v27 }
 0x1a6   :  { %1098 = vperm.xlu0 %1281, %v1063_v9   ;;  %v1055_v62 = vsub.f32 %v1039_v5, %v646_v43  ;;  %v1025_v43 = vand.u32 2147483647, %v1009_v18 }
 0x1a7   :  { %v523_v46 = vpop.permute.xlu1 %522  ;;  %v911_v13 = vpop.permute.xlu0 %910 }
 0x1a8   :  { %v639_v12 = vmul.f32 %v523_v46, %v1849_v42  ;;  %v1071_v23 = vmax.f32 %v1055_v62, 0.0  ;;  %v1003_v35 = vmul.f32 %v911_v13, %v1861_v21  ;;  %v1042_v5 = vadd.f32 %v1895_v4, %v1025_v43 }
 0x1aa   :  { %v1048_v6 = vsub.f32 %v1032_v58, %v639_v12 }
 0x1ab   :  { %v579_v15 = vpop.permute.xlu1 %578  ;;  %v530_v61 = vpop.permute.xlu0 %529 }
 0x1ac   :  { %v1064_v47 = vmax.f32 %v1048_v6, 0.0  ;;  %v647_v48 = vmul.f32 %v579_v15, %v1856_v17  ;;  %v640_v54 = vmul.f32 %v530_v61, %v370_v24  ;;  %v1002_v17 = vmul.f32 %v904_v63, %v1845_v52 }
 0x1ad   :  { %v1010_v63 = vmul.f32 %v960_v2, %v1843_v8 }
 0x1ae   :  { %v1056_v42 = vsub.f32 %v1040_v49, %v647_v48  ;;  %1101 = vperm.xlu1 %1282, %v1064_v47   ;;  %v1049_v0 = vsub.f32 %v1033_v44, %v640_v54  ;;  %v1018_v34 = vand.u32 2147483647, %v1002_v17 }
 0x1af   :  { %v967_v1 = vpop.permute.xlu1 %966  ;;  %v918_v11 = vpop.permute.xlu0 %917  ;;  %v1026_v38 = vand.u32 2147483647, %v1010_v63 }
 0x1b0   :  { %v1072_v7 = vmax.f32 %v1056_v42, 0.0  ;;  %v1065_v22 = vmax.f32 %v1049_v0, 0.0  ;;  %v1035_v27 = vadd.f32 %v1895_v4, %v1018_v34  ;;  %v1004_v16 = vmul.f32 %v918_v11, %v1868_v39 }
 0x1b1   :  { %v1011_v15 = vmul.f32 %v967_v1, %v1859_v20 }
 0x1b2   :  { %1122 = vperm.xlu1 %1282, %v1071_v23   ;;  %1125 = vperm.xlu0 %1281, %v1072_v7   ;;  %v1020_v62 = vand.u32 2147483647, %v1004_v16 }
 0x1b3   :  { %v586_v24 = vpop.permute.xlu1 %585  ;;  %v537_v3 = vpop.permute.xlu0 %536 }
 0x1b4   :  { %v648_v26 = vmul.f32 %v586_v24, %v1864_v57  ;;  %v641_v60 = vmul.f32 %v537_v3, %v1872_v50  ;;  %v1019_v57 = vand.u32 2147483647, %v1003_v35  ;;  %v1407_v35 = vmov 0.0  }
 0x1b5   :  { %93 = vst.msk [vmem:[#allocation2] sm:$0xff] %vm92_vm7, %v1407_v35  ;;  %94 = vst.msk [vmem:[#allocation2 + $0x8] sm:$0xff] %vm92_vm7, %v1407_v35 }
 0x1b6   :  { %v1057_v9 = vsub.f32 %v1041_v53, %v648_v26  ;;  %v1050_v31 = vsub.f32 %v1034_v14, %v641_v60  ;;  %1104 = vperm.xlu1 %1282, %v1065_v22   ;;  %v1036_v41 = vadd.f32 %v1895_v4, %v1019_v57 }
 0x1b7   :  { %v974_v46 = vpop.permute.xlu1 %973  ;;  %v925_v58 = vpop.permute.xlu0 %924 }
 0x1b8   :  { %v1073_v12 = vmax.f32 %v1057_v9, 0.0  ;;  %v1066_v52 = vmax.f32 %v1050_v31, 0.0  ;;  %v1005_v8 = vmul.f32 %v925_v58, %v1876_v51  ;;  %v1012_v44 = vmul.f32 %v974_v46, %v1866_v25 }
 0x1b9   :  { %v1037_v51 = vadd.f32 %v1895_v4, %v1020_v62 }
 0x1ba   :  { %1107 = vperm.xlu1 %1282, %v1066_v52   ;;  %1128 = vperm.xlu0 %1281, %v1073_v12   ;;  %v1021_v42 = vand.u32 2147483647, %v1005_v8  ;;  %v1028_v0 = vand.u32 2147483647, %v1012_v44 }
 0x1bb   :  { %v593_v19 = vpop.permute.xlu1 %592  ;;  %v544_v50 = vpop.permute.xlu0 %543 }
 0x1bc   :  { %v649_v21 = vmul.f32 %v593_v19, %v1870_v45  ;;  %v642_v13 = vmul.f32 %v544_v50, %v1880_v55  ;;  %v1043_v45 = vadd.f32 %v1895_v4, %v1026_v38  ;;  %v1027_v55 = vand.u32 2147483647, %v1011_v15 }
 0x1bd   :  { %v1038_v14 = vadd.f32 %v1895_v4, %v1021_v42  ;;  %v1045_v26 = vadd.f32 %v1895_v4, %v1028_v0  ;;  %v1079_v42 = vld [vmem:[#allocation2] sm:$0xff] }
 0x1be   :  { %v1058_v6 = vsub.f32 %v1042_v5, %v649_v21  ;;  %v1051_v49 = vsub.f32 %v1035_v27, %v642_v13  ;;  %v1044_v7 = vadd.f32 %v1895_v4, %v1027_v55 }
 0x1bf   :  { %v981_v2 = vpop.permute.xlu1 %980  ;;  %v551_v61 = vpop.permute.xlu0 %550 }
 0x1c0   :  { %v1074_v47 = vmax.f32 %v1058_v6, 0.0  ;;  %v1067_v48 = vmax.f32 %v1051_v49, 0.0  ;;  %v643_v39 = vmul.f32 %v551_v61, %v1884_v33  ;;  %v1013_v25 = vmul.f32 %v981_v2, %v1874_v28 }
 0x1c2   :  { %v1052_v54 = vsub.f32 %v1036_v41, %v643_v39  ;;  %1110 = vperm.xlu1 %1282, %v1067_v48   ;;  %1131 = vperm.xlu0 %1281, %v1074_v47   ;;  %v1029_v9 = vand.u32 2147483647, %v1013_v25 }
 0x1c3   :  { %v600_v59 = vpop.permute.xlu1 %599  ;;  %v558_v20 = vpop.permute.xlu0 %557 }
 0x1c4   :  { %v1068_v10 = vmax.f32 %v1052_v54, 0.0  ;;  %v650_v1 = vmul.f32 %v600_v59, %v1878_v29  ;;  %v644_v11 = vmul.f32 %v558_v20, %v1888_v56  ;;  %v1046_v46 = vadd.f32 %v1895_v4, %v1029_v9 }
 0x1c6   :  { %v1059_v23 = vsub.f32 %v1043_v45, %v650_v1  ;;  %v1053_v33 = vsub.f32 %v1037_v51, %v644_v11  ;;  %1113 = vperm.xlu1 %1282, %v1068_v10  }
 0x1c7   :  { %v607_v53 = vpop.permute.xlu1 %606  ;;  %v565_v17 = vpop.permute.xlu0 %564 }
 0x1c8   :  { %v1075_v24 = vmax.f32 %v1059_v23, 0.0  ;;  %v1069_v3 = vmax.f32 %v1053_v33, 0.0  ;;  %v651_v18 = vmul.f32 %v607_v53, %v1882_v32  ;;  %v645_v29 = vmul.f32 %v565_v17, %v1892_v40 }
 0x1ca   :  { %v1060_v22 = vsub.f32 %v1044_v7, %v651_v18  ;;  %v1054_v56 = vsub.f32 %v1038_v14, %v645_v29  ;;  %1116 = vperm.xlu1 %1282, %v1069_v3   ;;  %1134 = vperm.xlu0 %1281, %v1075_v24   ;;  %v1080_v18 = vld [vmem:[#allocation2 + $0x8] sm:$0xff] }
 0x1cb   :  { %v614_v60 = vpop.permute.xlu1 %613 }
 0x1cc   :  { %v1076_v31 = vmax.f32 %v1060_v22, 0.0  ;;  %v1070_v34 = vmax.f32 %v1054_v56, 0.0  ;;  %v652_v28 = vmul.f32 %v614_v60, %v1886_v36 }
 0x1ce   :  { %v1061_v32 = vsub.f32 %v1045_v26, %v652_v28  ;;  %1119 = vperm.xlu1 %1282, %v1070_v34   ;;  %1137 = vperm.xlu0 %1281, %v1076_v31  }
 0x1cf   :  { %v621_v40 = vpop.permute.xlu1 %620 }
 0x1d0   :  { %v1077_v58 = vmax.f32 %v1061_v32, 0.0  ;;  %v653_v43 = vmul.f32 %v621_v40, %v1890_v37 }
 0x1d2   :  { %v1062_v12 = vsub.f32 %v1046_v46, %v653_v43  ;;  %1140 = vperm.xlu0 %1281, %v1077_v58  }
 0x1d4   :  { %v1078_v52 = vmax.f32 %v1062_v12, 0.0  ;;  %v1248_v12 = vstv %s1268_s27 }
 0x1d6   :  { %1143 = vperm.xlu0 %1281, %v1078_v52  }
 0x225   :  { %v1099_v57 = vpop.permute.xlu0 %1098 }
 0x226   :  { %v1148_v37 = vrot.slane %v1099_v57, %v1706_v30 }
 0x22d   :  { %v1102_v27 = vpop.permute.xlu1 %1101 }
 0x22e   :  { %v1152_v6 = vrot.slane %v1102_v27, %v1706_v30 }
 0x230   :  { %v1209_v8 = vsel %vm479_vm0, %v1152_v6, %v1148_v37 }
 0x231   :  { %v1123_v36 = vpop.permute.xlu1 %1122  ;;  %v1126_v19 = vpop.permute.xlu0 %1125 }
 0x232   :  { %v1180_v45 = vrot.slane %v1123_v36, %v1706_v30  ;;  %v1184_v55 = vrot.slane %v1126_v19, %v1706_v30 }
 0x234   :  { %v1216_v7 = vsel %vm479_vm0, %v1184_v55, %v1180_v45 }
 0x235   :  { %v1105_v63 = vpop.permute.xlu1 %1104 }
 0x236   :  { %v1156_v4 = vrot.slane %v1105_v63, %v1706_v30 }
 0x238   :  { %v1210_v61 = vsel %vm481_vm1, %v1156_v4, %v1209_v8 }
 0x239   :  { %v1108_v50 = vpop.permute.xlu1 %1107  ;;  %v1129_v5 = vpop.permute.xlu0 %1128 }
 0x23a   :  { %v1160_v49 = vrot.slane %v1108_v50, %v1706_v30  ;;  %v1188_v20 = vrot.slane %v1129_v5, %v1706_v30 }
 0x23c   :  { %v1211_v47 = vsel %vm483_vm2, %v1160_v49, %v1210_v61  ;;  %v1217_v14 = vsel %vm481_vm1, %v1188_v20, %v1216_v7 }
 0x241   :  { %v1111_v16 = vpop.permute.xlu1 %1110  ;;  %v1132_v21 = vpop.permute.xlu0 %1131 }
 0x242   :  { %v1164_v38 = vrot.slane %v1111_v16, %v1706_v30  ;;  %v1192_v10 = vrot.slane %v1132_v21, %v1706_v30 }
 0x244   :  { %v1212_v48 = vsel %vm485_vm3, %v1164_v38, %v1211_v47  ;;  %v1218_v53 = vsel %vm483_vm2, %v1192_v10, %v1217_v14 }
 0x245   :  { %v1114_v13 = vpop.permute.xlu1 %1113 }
 0x246   :  { %v1168_v2 = vrot.slane %v1114_v13, %v1706_v30 }
 0x248   :  { %v1213_v44 = vsel %vm487_vm4, %v1168_v2, %v1212_v48 }
 0x249   :  { %v1117_v41 = vpop.permute.xlu1 %1116  ;;  %v1135_v15 = vpop.permute.xlu0 %1134 }
 0x24a   :  { %v1172_v62 = vrot.slane %v1117_v41, %v1706_v30  ;;  %v1196_v11 = vrot.slane %v1135_v15, %v1706_v30 }
 0x24c   :  { %v1214_v51 = vsel %vm489_vm5, %v1172_v62, %v1213_v44  ;;  %v1219_v17 = vsel %vm485_vm3, %v1196_v11, %v1218_v53 }
 0x24d   :  { %v1120_v39 = vpop.permute.xlu1 %1119  ;;  %v1138_v54 = vpop.permute.xlu0 %1137 }
 0x24e   :  { %v1176_v59 = vrot.slane %v1120_v39, %v1706_v30  ;;  %v1200_v0 = vrot.slane %v1138_v54, %v1706_v30 }
 0x250   :  { %v1215_v1 = vsel %vm491_vm6, %v1176_v59, %v1214_v51  ;;  %v1220_v3 = vsel %vm487_vm4, %v1200_v0, %v1219_v17 }
 0x251   :  { %v1225_v23 = vadd.f32 %v1215_v1, %v1079_v42  ;;  %v1141_v33 = vpop.permute.xlu0 %1140 }
 0x252   :  { %v1204_v25 = vrot.slane %v1141_v33, %v1706_v30 }
 0x253   :  { %1228 = vst.msk [vmem:[#allocation2] sm:$0xff] %vm92_vm7, %v1225_v23 }
 0x254   :  { %v1221_v22 = vsel %vm489_vm5, %v1204_v25, %v1220_v3 }
 0x255   :  { %v1144_v24 = vpop.permute.xlu0 %1143 }
 0x256   :  { %v1208_v29 = vrot.slane %v1144_v24, %v1706_v30 }
 0x258   :  { %v1222_v56 = vsel %vm491_vm6, %v1208_v29, %v1221_v22 }
 0x259   :  { %v1226_v26 = vadd.f32 %v1222_v56, %v1080_v18 }
 0x25a   :  { %v1233_v60 = vld [vmem:[#allocation2] sm:$0xff] }
 0x25b   :  { %1229 = vst.msk [vmem:[#allocation2 + $0x8] sm:$0xff] %vm92_vm7, %v1226_v26  ;;  %v1235_v31 = vsel %vm92_vm7, %v1233_v60, 0.0 }
 0x262   :  { %v1234_v9 = vld [vmem:[#allocation2 + $0x8] sm:$0xff] }
 0x263   :  { %v1236_v34 = vsel %vm92_vm7, %v1234_v9, 0.0 }
 0x264   :  { %v1237_v28 = vadd.f32 %v1236_v34, %v1235_v31 }
 0x266   :  { %1238 = vadd.xlane.f32.xlu1 %v1237_v28 }
 0x2f3   :  { %v1239_v35 = vpop.xlane.xlu1 %1238 }
 0x2f4   :  { %v1240_v32 = vrot.slane %v1239_v35, 4 }
 0x2f6   :  { %v1241_v40 = vadd.f32 %v1240_v32, %v1239_v35 }
 0x2f8   :  { %v1242_v46 = vrot.slane %v1241_v40, 2 }
 0x2fa   :  { %v1243_v30 = vadd.f32 %v1242_v46, %v1241_v40 }
 0x2fc   :  { %v1244_v58 = vrot.slane %v1243_v30, 1 }
 0x2fe   :  { %v1245_v43 = vadd.f32 %v1244_v58, %v1243_v30 }
 0x300   :  { %1269 = vpush %v1245_v43 }
 0x331   :  { %s1270_s11 = spop %1269 }
 0x332   :  { %v1247_v52 = vstv %s1270_s11 }
 0x333   :  { %v1249_v27 = vmul.f32 %v1248_v12, %v1247_v52 }
 0x335   :  { %1250 = vst [vmem:[#allocation11] sm:$0xff] %v1249_v27 }
 0x336   :  { %1380 = shalt.err (!%p1377_p3)
}
 0x337   :  { %s1381_s2 = scalar_lea.hbm %s1993_s4, 128 }
 0x338   :  { %p1382_p4 = scmp.ne.s32.totalorder %s1993_s4, %s1381_s2  ;;  %p1385_p5 = scmp.lt.u32.totalorder %s1381_s2, %s1993_s4 }
 0x33a   :  { %p1387_p6 = pnand %p1385_p5, %p1382_p4 }
 0x33c   :  { %1390 = shalt.err (!%p1387_p6)
}
 0x33d   :  { %1260 = dma.vmem_to_hbm [thread:$0]  %s1258_s10, 128, %s1993_s4, [#allocation5]  }
 0x33e   :  { %1397 = dma.done.wait [#allocation5], 128  }
 0x33f   :  { %1398 = vsyncadd [#allocation5], 4294967168 }
 0x340   :  { %1264 = vsyncpa [#allocation4], 1 }
 0x341   :  { %1265 = vsyncpa [#allocation9], 1 }
 0x342   :  { %1266 = vsyncpa [#allocation5], 1 }
 0x343   :  { %1267 = vsyncpa [#allocation6], 1 }

</bundles_post_ra>
